<compile_context>
chip_gen: v7x
topology: tpu7x:2x2x1
jax: 0.10.0
libtpu: 0.0.40
codegen_flags: <defaults>
</compile_context>

<pallas_src>
import numpy as np
import jax
import jax.numpy as jnp
from jax.experimental import pallas as pl
from jax.experimental.pallas import tpu as pltpu  # noqa: F401  (TPU backend)

# ----------------------------- config (small) ------------------------------
E = 32            # embedding_size (768 in the original)
V = 16            # surrogate vocab size
L = 8             # sequence length
N_HID = 16        # args.n_hid
N_LAST = 8        # args.n_last
MLP_SIZE = 32     # args.mlp_size
HEAD_NUMBER = 1   # args.head_number (attention=False -> single head)
NSUM = HEAD_NUMBER * N_LAST
TOKEN_IDS = np.asarray([2, 3], np.int32)   # surrogate for [50265, 50266]

# ----------------- static padded maxima (one compile forever) --------------
MAX_DOCS = 2
MAX_PAIRS = 8        # event pairs (K)
MAX_NODES = 8        # mention nodes
MAX_CLUSTERS = 8     # coref clusters ("new nodes")
MAX_EDGES = 8        # hyperedges (<= MAX_CLUSTERS by construction)
DOC_TOK = MAX_DOCS * L          # 16
NODE_TOK = MAX_NODES * L        # 64

# -------- encoder weight slab layout (rows x E), 8-aligned row blocks ------
EMB0_R = 0                      # (V, E)      frozen token embedding
W0_R = EMB0_R + V               # (E, E)      frozen dense projection
B0_R = W0_R + E                 # (1, E)
LMW_R = B0_R + 8                # (E, 2->E)   LM head, TOKEN_IDS columns only
LMB_R = LMW_R + E               # (1, 2->E)
EMB1_R = LMB_R + 8              # (V, E)      trainable token embedding
W1_R = EMB1_R + V               # (E, E)
B1_R = W1_R + E                 # (1, E)
ENC_ROWS = B1_R + 8             # 152

# --------------- head weight slab layout (rows x MLP_SIZE) -----------------
TH1_R = 0                       # (E, N_HID)
BI1_R = TH1_R + E               # (1, N_HID)
TH2_R = BI1_R + 8               # (N_HID, N_LAST)
BI2_R = TH2_R + N_HID           # (1, N_LAST)
W1S_R = BI2_R + 8               # (NSUM, MLP_SIZE)   mlp_W1 rows for (e1 + e2)
W1D_R = W1S_R + NSUM            # (NSUM, MLP_SIZE)   mlp_W1 rows for (e1 - e2)
W1A_R = W1D_R + NSUM            # (E, MLP_SIZE)      mlp_W1 rows for pair half 1
W1B_R = W1A_R + E               # (E, MLP_SIZE)      mlp_W1 rows for pair half 2
MB1_R = W1B_R + E               # (1, MLP_SIZE)
W2_R = MB1_R + 8                # (MLP_SIZE, 2)
MB2_R = W2_R + MLP_SIZE         # (1, 2)
HEAD_ROWS = MB2_R + 8           # 192

# ---------------- per-forward encoder data slab (rows x DATA_W) ------------
DATA_W = max(V, DOC_TOK, NODE_TOK)
DOC_R = 0                        # (DOC_TOK, V)          doc token one-hots
NODEOH_R = DOC_R + DOC_TOK       # (NODE_TOK, V)         node token one-hots
SEP0_R = NODEOH_R + NODE_TOK     # (MAX_PAIRS, DOC_TOK)  select event-1 trigger rows
SEP1_R = SEP0_R + MAX_PAIRS      # (MAX_PAIRS, DOC_TOK)  select event-2 trigger rows
SMSK_R = SEP1_R + MAX_PAIRS      # (MAX_PAIRS, DOC_TOK)  select <mask> rows
SNODE_R = SMSK_R + MAX_PAIRS     # (MAX_NODES, NODE_TOK) select node trigger rows
DATA_ROWS = SNODE_R + MAX_NODES  # 112

# ---------------- per-forward head graph slab (rows x GRAPH_W) -------------
GRAPH_W = max(MAX_NODES, MAX_EDGES, MAX_CLUSTERS)
A_R = 0                          # (MAX_CLUSTERS, MAX_NODES)  coref-average
HS_R = A_R + MAX_CLUSTERS        # (MAX_CLUSTERS, MAX_EDGES)  Dv^-1 H
HTS_R = HS_R + MAX_CLUSTERS      # (MAX_EDGES, MAX_CLUSTERS)  De^-1 H^T
G1_R = HTS_R + MAX_EDGES         # (MAX_PAIRS, MAX_CLUSTERS)  pair -> cluster(e1)
G2_R = G1_R + MAX_PAIRS          # (MAX_PAIRS, MAX_CLUSTERS)  pair -> cluster(e2)
GRAPH_ROWS = G2_R + MAX_PAIRS    # 40


# ------------------------------ Pallas kernels ------------------------------
# Whole-array operands resident in VMEM (no grid); total footprint is a few
# tens of KiB, far below the scoped VMEM limit on all generations.

def _encoder_kernel(data_ref, w_ref, e1_out, e2_out, node_out, predt_out):
    f32 = jnp.float32
    dot = lambda a, b: jnp.dot(a, b, preferred_element_type=f32)

    # per-forward data slab (token one-hots + structural selection matrices)
    doc_oh = data_ref[DOC_R:DOC_R + DOC_TOK, :V]
    node_oh = data_ref[NODEOH_R:NODEOH_R + NODE_TOK, :V]
    s_ep0 = data_ref[SEP0_R:SEP0_R + MAX_PAIRS, :DOC_TOK]
    s_ep1 = data_ref[SEP1_R:SEP1_R + MAX_PAIRS, :DOC_TOK]
    s_mask = data_ref[SMSK_R:SMSK_R + MAX_PAIRS, :DOC_TOK]
    s_node = data_ref[SNODE_R:SNODE_R + MAX_NODES, :NODE_TOK]

    # packed static encoder weights (single operand -> single DMA)
    emb0 = w_ref[EMB0_R:EMB0_R + V, :]
    w0 = w_ref[W0_R:W0_R + E, :]
    b0 = w_ref[B0_R:B0_R + 1, :]
    lm_w = w_ref[LMW_R:LMW_R + E, :]     # cols 0/1 = TOKEN_IDS columns of LM head
    lm_b = w_ref[LMB_R:LMB_R + 1, :]
    emb1 = w_ref[EMB1_R:EMB1_R + V, :]
    w1 = w_ref[W1_R:W1_R + E, :]
    b1 = w_ref[B1_R:B1_R + 1, :]

    # frozen MLM-roberta surrogate: token embedding -> dense projection
    sent = dot(dot(doc_oh, emb0), w0) + b0                     # (DOC_TOK, E)
    # extract_event_pair: the two trigger rows of every event pair
    e1_out[...] = dot(s_ep0, sent)                             # (MAX_PAIRS, E)
    e2_out[...] = dot(s_ep1, sent)                             # (MAX_PAIRS, E)

    # fused LM head restricted to the two mask-token columns + on-device argmax;
    # only MAX_PAIRS int32 predictions ever leave the device.
    masked = dot(s_mask, sent)                                 # (MAX_PAIRS, E)
    mlm2 = dot(masked, lm_w) + lm_b                            # cols 0/1 meaningful
    predt_out[...] = jnp.where(mlm2[:, 1:2] > mlm2[:, 0:1], 1, 0).astype(jnp.int32)

    # trainable roberta surrogate (node encoder) + extract_node
    nsent = dot(dot(node_oh, emb1), w1) + b1                   # (NODE_TOK, E)
    node_out[...] = dot(s_node, nsent)                         # (MAX_NODES, E)


def pallas_encoder(data_slab, enc_slab):
    return pl.pallas_call(
        _encoder_kernel,
        out_shape=(jax.ShapeDtypeStruct((MAX_PAIRS, E), jnp.float32),
                   jax.ShapeDtypeStruct((MAX_PAIRS, E), jnp.float32),
                   jax.ShapeDtypeStruct((MAX_NODES, E), jnp.float32),
                   jax.ShapeDtypeStruct((MAX_PAIRS, 1), jnp.int32)),
    )(data_slab, enc_slab)


def _head_kernel(g_ref, nemb_ref, e1_ref, e2_ref, w_ref, o_ref):
    f32 = jnp.float32
    dot = lambda a, b: jnp.dot(a, b, preferred_element_type=f32)

    # per-forward graph slab (single operand)
    A = g_ref[A_R:A_R + MAX_CLUSTERS, :MAX_NODES]        # coref-average matrix
    hs = g_ref[HS_R:HS_R + MAX_CLUSTERS, :MAX_EDGES]     # Dv^-1 H   (host pre-scaled)
    hts = g_ref[HTS_R:HTS_R + MAX_EDGES, :MAX_CLUSTERS]  # De^-1 H^T (host pre-scaled)
    g1 = g_ref[G1_R:G1_R + MAX_PAIRS, :MAX_CLUSTERS]
    g2 = g_ref[G2_R:G2_R + MAX_PAIRS, :MAX_CLUSTERS]

    # packed static head weights (single operand)
    th1 = w_ref[TH1_R:TH1_R + E, :N_HID]
    bi1 = w_ref[BI1_R:BI1_R + 1, :N_HID]
    th2 = w_ref[TH2_R:TH2_R + N_HID, :N_LAST]
    bi2 = w_ref[BI2_R:BI2_R + 1, :N_LAST]
    w1s = w_ref[W1S_R:W1S_R + NSUM, :]
    w1d = w_ref[W1D_R:W1D_R + NSUM, :]
    w1a = w_ref[W1A_R:W1A_R + E, :]
    w1b = w_ref[W1B_R:W1B_R + E, :]
    mb1 = w_ref[MB1_R:MB1_R + 1, :]
    w2 = w_ref[W2_R:W2_R + MLP_SIZE, :2]
    mb2 = w_ref[MB2_R:MB2_R + 1, :2]

    # coreference merge: average mentions of the same entity
    x = dot(A, nemb_ref[...])                            # (MAX_CLUSTERS, E)

    def hconv(xx, th, bi):
        # HypergraphConv (use_attention=False): Dv^-1 H De^-1 H^T (X Theta) + b
        # padded (zero) rows/columns of H contribute nothing (degrees -> 0).
        return dot(hs, dot(hts, dot(xx, th))) + bi

    x = jnp.maximum(hconv(x, th1, bi1), 0.0)              # HGNN1 + ReLU (dropout=id)
    x = hconv(x, th2, bi2)                                # HGNN2 -> (MAX_CLUSTERS, N_LAST)

    n1 = dot(g1, x)                                       # cluster embed of event 1
    n2 = dot(g2, x)                                       # cluster embed of event 2
    # MLP layer 1.  Identical to the original concat([e1+e2, e1-e2, pair]) @ W1:
    # W1 is split into the matching row blocks (weight-compatible; no in-kernel
    # concat needed).
    h = (dot(n1 + n2, w1s) + dot(n1 - n2, w1d)
         + dot(e1_ref[...], w1a) + dot(e2_ref[...], w1b) + mb1)
    h = jnp.maximum(h, 0.0)                               # ReLU (dropout=id)
    o_ref[...] = (dot(h, w2) + mb2).astype(o_ref.dtype)


def pallas_head(graph_slab, node_emb, e1p, e2p, head_slab):
    return pl.pallas_call(
        _head_kernel,
        out_shape=jax.ShapeDtypeStruct((MAX_PAIRS, 2), jnp.float32),
    )(graph_slab, node_emb, e1p, e2p, head_slab)


# ------------------------------ jitted segments -----------------------------
# All argument shapes are fixed padded maxima -> single compile per segment.

@jax.jit
def encode_segment(enc_slab, data_slab):
    return pallas_encoder(data_slab, enc_slab)


@jax.jit
def head_segment(head_slab, graph_slab, node_emb, e1p, e2p):
    return pallas_head(graph_slab, node_emb, e1p, e2p, head_slab)


# ---------------------- host-side per-forward data slabs --------------------

def build_data_slab(event_arg, event_e, mask_indices, node_arg, node_e,
                    document_size):
    event_arg = np.asarray(event_arg)
    node_arg = np.asarray(node_arg)
    node_size = node_arg.shape[0]
    ep0, ep1, mid = [], [], []
    for j in range(document_size):
        for (p0, p1) in event_e[j]:
            ep0.append(j * L + p0)
            ep1.append(j * L + p1)
        for m in mask_indices[j]:
            mid.append(j * L + m)
    K = len(ep0)
    assert K == len(mid) and K <= MAX_PAIRS
    assert document_size <= MAX_DOCS and node_size <= MAX_NODES

    data = np.zeros((DATA_ROWS, DATA_W), np.float32)
    doc_tok = event_arg.reshape(-1).astype(np.int64)
    data[DOC_R + np.arange(doc_tok.size), doc_tok] = 1.0
    node_tok = node_arg.reshape(-1).astype(np.int64)
    data[NODEOH_R + np.arange(node_tok.size), node_tok] = 1.0
    data[SEP0_R + np.arange(K), np.asarray(ep0, np.int64)] = 1.0
    data[SEP1_R + np.arange(K), np.asarray(ep1, np.int64)] = 1.0
    data[SMSK_R + np.arange(K), np.asarray(mid, np.int64)] = 1.0
    node_pos = np.arange(node_size) * L + np.asarray(node_e, np.int64)
    data[SNODE_R + np.arange(node_size), node_pos] = 1.0
    return data, K


def build_graph_slab(hyperedge_index, new_node_id, event_id, node_size,
                     num_new_nodes):
    K = event_id.shape[0]
    assert num_new_nodes <= MAX_CLUSTERS and K <= MAX_PAIRS
    graph = np.zeros((GRAPH_ROWS, GRAPH_W), np.float32)

    # coref-average matrix (mention -> entity-cluster mean), vectorized scatter
    counts = np.bincount(new_node_id, minlength=num_new_nodes).astype(np.float32)
    assert np.all(counts > 0)
    graph[A_R + new_node_id, np.arange(node_size)] = 1.0 / counts[new_node_id]

    # incidence H, pre-scaled into Dv^-1 H and De^-1 H^T (degree scaling folded,
    # no in-kernel transpose / sublane-dim contraction)
    Hm = np.zeros((MAX_CLUSTERS, MAX_EDGES), np.float32)
    if hyperedge_index.shape[1] > 0:
        assert int(hyperedge_index[1].max()) + 1 <= MAX_EDGES
        Hm[hyperedge_index[0], hyperedge_index[1]] = 1.0
    deg_v = Hm.sum(1)
    deg_e = Hm.sum(0)
    dv_inv = np.where(deg_v > 0, 1.0 / np.maximum(deg_v, 1.0), 0.0)
    de_inv = np.where(deg_e > 0, 1.0 / np.maximum(deg_e, 1.0), 0.0)
    graph[HS_R:HS_R + MAX_CLUSTERS, :MAX_EDGES] = Hm * dv_inv[:, None]
    graph[HTS_R:HTS_R + MAX_EDGES, :MAX_CLUSTERS] = Hm.T * de_inv[:, None]

    # event-pair -> cluster one-hot gathers
    graph[G1_R + np.arange(K), new_node_id[event_id[:, 0]]] = 1.0
    graph[G2_R + np.arange(K), new_node_id[event_id[:, 1]]] = 1.0
    return graph


# ---------------------- host-side hypergraph construction -------------------
# Pure data-dependent control flow (no clean Pallas equivalent); runs on host
# from the K int32 predictions only.

def get_hyperedge_index(predt, event_id, event_co_id, label, training=False):
    predt = np.asarray(predt)
    event_id = np.asarray(event_id)
    event_co_id = np.asarray(event_co_id)
    label = np.asarray(label)
    num_new_nodes = int(event_co_id.max()) + 1
    nodes_all, edges_all = [], []
    t = 0
    for i in range(num_new_nodes):
        hyperedge = []
        temp_node_id = np.nonzero(event_co_id == i)[0]
        num_co = len(temp_node_id)
        assert num_co != 0

        def _maybe_add(pos, col):
            keep = (label[pos] > 0) if training else (predt[pos] > 0)
            if keep:
                e2_id = int(event_id[pos, 1 - int(col)])
                e2_co = int(event_co_id[e2_id])
                if e2_co not in hyperedge:
                    if len(hyperedge) == 0:
                        hyperedge.extend([i, e2_co])
                    else:
                        hyperedge.append(e2_co)

        if num_co == 1:
            e1_id = int(temp_node_id[0])
            if not np.any(event_id == e1_id):
                continue
            rows, cols = np.nonzero(event_id == e1_id)
            for pos, col in zip(rows, cols):
                _maybe_add(int(pos), int(col))
        else:
            hyperedge.append(i)
            for e1_id in temp_node_id:
                if not np.any(event_id == int(e1_id)):
                    continue
                rows, cols = np.nonzero(event_id == int(e1_id))
                for pos, col in zip(rows, cols):
                    _maybe_add(int(pos), int(col))

        if len(hyperedge) > 0:
            nodes_all.extend(hyperedge)
            edges_all.extend([t] * len(hyperedge))
            t += 1
    if t == 0:
        return np.zeros((2, 0), dtype=np.int32)
    return np.stack([np.asarray(nodes_all, np.int32),
                     np.asarray(edges_all, np.int32)])


# ---------------------------------- params ----------------------------------

def init_params(key):
    ks = jax.random.split(key, 9)
    s = 0.02
    rnd = lambda k, shp: np.asarray(jax.random.normal(k, shp, jnp.float32)) * s

    emb0 = rnd(ks[0], (V, E))
    w_enc0 = rnd(ks[1], (E, E))
    b_enc0 = np.zeros((1, E), np.float32)
    lm_w = rnd(ks[2], (E, V))
    lm_b = np.zeros((1, V), np.float32)
    emb1 = rnd(ks[3], (V, E))
    w_enc1 = rnd(ks[4], (E, E))
    b_enc1 = np.zeros((1, E), np.float32)
    theta1 = rnd(ks[5], (E, N_HID))
    bias1 = np.zeros((1, N_HID), np.float32)
    theta2 = rnd(ks[6], (N_HID, N_LAST))
    bias2 = np.zeros((1, N_LAST), np.float32)
    # mlp_W1 input rows ordered exactly as the original concat:
    #   [ (e1+e2): NSUM | (e1-e2): NSUM | event_pair_embed: 2E ]
    mlp_w1 = rnd(ks[7], (2 * NSUM + 2 * E, MLP_SIZE))
    mlp_b1 = np.zeros((1, MLP_SIZE), np.float32)
    mlp_w2 = rnd(ks[8], (MLP_SIZE, 2))
    mlp_b2 = np.zeros((1, 2), np.float32)

    def put(dst, r0, a):
        dst[r0:r0 + a.shape[0], :a.shape[1]] = a

    enc = np.zeros((ENC_ROWS, E), np.float32)
    put(enc, EMB0_R, emb0)
    put(enc, W0_R, w_enc0)
    put(enc, B0_R, b_enc0)
    put(enc, LMW_R, lm_w[:, TOKEN_IDS])   # only the two mask-token columns
    put(enc, LMB_R, lm_b[:, TOKEN_IDS])
    put(enc, EMB1_R, emb1)
    put(enc, W1_R, w_enc1)
    put(enc, B1_R, b_enc1)

    head = np.zeros((HEAD_ROWS, MLP_SIZE), np.float32)
    put(head, TH1_R, theta1)
    put(head, BI1_R, bias1)
    put(head, TH2_R, theta2)
    put(head, BI2_R, bias2)
    put(head, W1S_R, mlp_w1[:NSUM])
    put(head, W1D_R, mlp_w1[NSUM:2 * NSUM])
    put(head, W1A_R, mlp_w1[2 * NSUM:2 * NSUM + E])
    put(head, W1B_R, mlp_w1[2 * NSUM + E:])
    put(head, MB1_R, mlp_b1)
    put(head, W2_R, mlp_w2)
    put(head, MB2_R, mlp_b2)

    return {"enc_slab": jnp.asarray(enc), "head_slab": jnp.asarray(head)}


# ---------------------------------- forward ---------------------------------

def nchm_forward(p, event_arg, event_mask, event_e, mask_indices, event_id,
                 node_arg, node_mask, node_e, document_size, label, event_co_id,
                 training=False):
    del event_mask, node_mask  # TODO(synk): surrogate encoder ignores attention masks

    event_id = np.asarray(event_id)
    label = np.asarray(label)
    new_node_id = np.asarray(event_co_id[1])
    node_size = np.asarray(node_arg).shape[0]
    num_new_nodes = int(new_node_id.max()) + 1

    # per-forward encoder data slab (one H2D transfer); vectorized numpy scatters.
    # TODO(synk): in a training loop this structural slab is precomputable per batch.
    data, K = build_data_slab(event_arg, event_e, mask_indices, node_arg, node_e,
                              document_size)

    # ---- segment 1: single fused Pallas encoder launch (static shapes)
    e1p, e2p, node_emb, predt_dev = encode_segment(p["enc_slab"], data)

    # ---- single tiny D2H sync: K int32 mask predictions
    predt = np.asarray(jax.device_get(predt_dev))[:K, 0]

    # ---- host-only data-dependent hypergraph construction
    hyperedge_index = get_hyperedge_index(predt, event_id, new_node_id, label,
                                          training=training)
    graph = build_graph_slab(hyperedge_index, new_node_id, event_id, node_size,
                             num_new_nodes)

    # attention=False: hyperedge embeddings are unused by HypergraphConv -> skipped.

    # ---- segment 2: single fused Pallas head launch (static padded shapes)
    pre = head_segment(p["head_slab"], graph, node_emb, e1p, e2p)
    return pre[:K]


# ------------------------------------ main -----------------------------------

if __name__ == "__main__":
    key = jax.random.PRNGKey(0)
    pkey, dkey1, dkey2 = jax.random.split(key, 3)
    params = init_params(pkey)

    document_size = 2
    node_size = 4

    event_arg = np.asarray(jax.random.randint(dkey1, (document_size, L), 0, V),
                           dtype=np.int32)
    event_mask = np.ones((document_size, L), np.int32)
    event_e = [[(1, 4)], [(2, 5)]]          # one event pair per document
    mask_indices = [[3], [3]]               # <mask> position per pair
    event_id = np.asarray([[0, 1], [2, 3]], np.int32)   # K = 2 event pairs
    node_arg = np.asarray(jax.random.randint(dkey2, (node_size, L), 0, V),
                          dtype=np.int32)
    node_mask = np.ones((node_size, L), np.int32)
    node_e = [0, 2, 1, 3]                   # trigger position per mention node
    event_co_id = (np.arange(node_size, dtype=np.int32),
                   np.asarray([0, 1, 2, 1], np.int32))  # mention -> entity cluster
    label = np.asarray([1, 0], np.int32)

    pre = nchm_forward(params, event_arg, event_mask, event_e, mask_indices,
                       event_id, node_arg, node_mask, node_e, document_size,
                       label, event_co_id, training=False)
    pre = jax.block_until_ready(pre)
    assert pre.shape == (len(event_id), 2)
    print("KERNEL_OK")
</pallas_src>

<mosaic_0001>
module attributes {stable_mosaic.version = 11 : i64} {
  func.func @_encoder_kernel(%arg0: memref<112x64xf32, #tpu.memory_space<vmem>>, %arg1: memref<152x32xf32, #tpu.memory_space<vmem>>, %arg2: memref<8x32xf32, #tpu.memory_space<vmem>>, %arg3: memref<8x32xf32, #tpu.memory_space<vmem>>, %arg4: memref<8x32xf32, #tpu.memory_space<vmem>>, %arg5: memref<8x1xi32, #tpu.memory_space<vmem>>) attributes {dimension_semantics = [], scalar_prefetch = 0 : i64, scratch_operands = 0 : i64, tpu.core_type = #tpu.core_type<tc>} {
    %c0 = arith.constant 0 : index
    %c0_0 = arith.constant 0 : index
    %0 = vector.load %arg0[%c0, %c0_0] : memref<112x64xf32, #tpu.memory_space<vmem>>, vector<16x16xf32>
    %c16 = arith.constant 16 : index
    %c0_1 = arith.constant 0 : index
    %1 = vector.load %arg0[%c16, %c0_1] : memref<112x64xf32, #tpu.memory_space<vmem>>, vector<64x16xf32>
    %c80 = arith.constant 80 : index
    %c0_2 = arith.constant 0 : index
    %2 = vector.load %arg0[%c80, %c0_2] : memref<112x64xf32, #tpu.memory_space<vmem>>, vector<8x16xf32>
    %c88 = arith.constant 88 : index
    %c0_3 = arith.constant 0 : index
    %3 = vector.load %arg0[%c88, %c0_3] : memref<112x64xf32, #tpu.memory_space<vmem>>, vector<8x16xf32>
    %c96 = arith.constant 96 : index
    %c0_4 = arith.constant 0 : index
    %4 = vector.load %arg0[%c96, %c0_4] : memref<112x64xf32, #tpu.memory_space<vmem>>, vector<8x16xf32>
    %c104 = arith.constant 104 : index
    %c0_5 = arith.constant 0 : index
    %5 = vector.load %arg0[%c104, %c0_5] : memref<112x64xf32, #tpu.memory_space<vmem>>, vector<8x64xf32>
    %c0_6 = arith.constant 0 : index
    %c0_7 = arith.constant 0 : index
    %6 = vector.load %arg1[%c0_6, %c0_7] : memref<152x32xf32, #tpu.memory_space<vmem>>, vector<16x32xf32>
    %c16_8 = arith.constant 16 : index
    %c0_9 = arith.constant 0 : index
    %7 = vector.load %arg1[%c16_8, %c0_9] : memref<152x32xf32, #tpu.memory_space<vmem>>, vector<32x32xf32>
    %c48 = arith.constant 48 : index
    %c0_10 = arith.constant 0 : index
    %8 = vector.load %arg1[%c48, %c0_10] : memref<152x32xf32, #tpu.memory_space<vmem>>, vector<1x32xf32>
    %c56 = arith.constant 56 : index
    %c0_11 = arith.constant 0 : index
    %9 = vector.load %arg1[%c56, %c0_11] : memref<152x32xf32, #tpu.memory_space<vmem>>, vector<32x32xf32>
    %c88_12 = arith.constant 88 : index
    %c0_13 = arith.constant 0 : index
    %10 = vector.load %arg1[%c88_12, %c0_13] : memref<152x32xf32, #tpu.memory_space<vmem>>, vector<1x32xf32>
    %c96_14 = arith.constant 96 : index
    %c0_15 = arith.constant 0 : index
    %11 = vector.load %arg1[%c96_14, %c0_15] : memref<152x32xf32, #tpu.memory_space<vmem>>, vector<16x32xf32>
    %c112 = arith.constant 112 : index
    %c0_16 = arith.constant 0 : index
    %12 = vector.load %arg1[%c112, %c0_16] : memref<152x32xf32, #tpu.memory_space<vmem>>, vector<32x32xf32>
    %c144 = arith.constant 144 : index
    %c0_17 = arith.constant 0 : index
    %13 = vector.load %arg1[%c144, %c0_17] : memref<152x32xf32, #tpu.memory_space<vmem>>, vector<1x32xf32>
    %cst = arith.constant dense<0.000000e+00> : vector<16x32xf32>
    %14 = tpu.matmul %0, %6, %cst {dimension_numbers = #tpu.dot_dimension_numbers<[1], [0], [0], [1], [0, 0, 1, 1], [], []>} : vector<16x16xf32>, vector<16x32xf32>, vector<16x32xf32> -> vector<16x32xf32>
    %cst_18 = arith.constant dense<0.000000e+00> : vector<16x32xf32>
    %15 = tpu.matmul %14, %7, %cst_18 {dimension_numbers = #tpu.dot_dimension_numbers<[1], [0], [0], [1], [0, 0, 1, 1], [], []>} : vector<16x32xf32>, vector<32x32xf32>, vector<16x32xf32> -> vector<16x32xf32>
    %16 = vector.broadcast %8 : vector<1x32xf32> to vector<16x32xf32>
    %17 = arith.addf %15, %16 : vector<16x32xf32>
    %cst_19 = arith.constant dense<0.000000e+00> : vector<8x32xf32>
    %18 = tpu.matmul %2, %17, %cst_19 {dimension_numbers = #tpu.dot_dimension_numbers<[1], [0], [0], [1], [0, 0, 1, 1], [], []>} : vector<8x16xf32>, vector<16x32xf32>, vector<8x32xf32> -> vector<8x32xf32>
    %c0_20 = arith.constant 0 : index
    %c0_21 = arith.constant 0 : index
    %19 = vector.load %arg2[%c0_20, %c0_21] : memref<8x32xf32, #tpu.memory_space<vmem>>, vector<8x32xf32>
    tpu.vector_store %arg2[%c0_20, %c0_21], %18 {strides = array<i32>} : memref<8x32xf32, #tpu.memory_space<vmem>>, vector<8x32xf32>,
    %cst_22 = arith.constant dense<0.000000e+00> : vector<8x32xf32>
    %20 = tpu.matmul %3, %17, %cst_22 {dimension_numbers = #tpu.dot_dimension_numbers<[1], [0], [0], [1], [0, 0, 1, 1], [], []>} : vector<8x16xf32>, vector<16x32xf32>, vector<8x32xf32> -> vector<8x32xf32>
    %c0_23 = arith.constant 0 : index
    %c0_24 = arith.constant 0 : index
    %21 = vector.load %arg3[%c0_23, %c0_24] : memref<8x32xf32, #tpu.memory_space<vmem>>, vector<8x32xf32>
    tpu.vector_store %arg3[%c0_23, %c0_24], %20 {strides = array<i32>} : memref<8x32xf32, #tpu.memory_space<vmem>>, vector<8x32xf32>,
    %cst_25 = arith.constant dense<0.000000e+00> : vector<8x32xf32>
    %22 = tpu.matmul %4, %17, %cst_25 {dimension_numbers = #tpu.dot_dimension_numbers<[1], [0], [0], [1], [0, 0, 1, 1], [], []>} : vector<8x16xf32>, vector<16x32xf32>, vector<8x32xf32> -> vector<8x32xf32>
    %cst_26 = arith.constant dense<0.000000e+00> : vector<8x32xf32>
    %23 = tpu.matmul %22, %9, %cst_26 {dimension_numbers = #tpu.dot_dimension_numbers<[1], [0], [0], [1], [0, 0, 1, 1], [], []>} : vector<8x32xf32>, vector<32x32xf32>, vector<8x32xf32> -> vector<8x32xf32>
    %24 = vector.broadcast %10 : vector<1x32xf32> to vector<8x32xf32>
    %25 = arith.addf %23, %24 : vector<8x32xf32>
    %26 = vector.extract_strided_slice %25 {offsets = [0, 1], sizes = [8, 1], strides = [1, 1]} : vector<8x32xf32> to vector<8x1xf32>
    %27 = vector.extract_strided_slice %25 {offsets = [0, 0], sizes = [8, 1], strides = [1, 1]} : vector<8x32xf32> to vector<8x1xf32>
    %28 = arith.cmpf ogt, %26, %27 : vector<8x1xf32>
    %c1_i32 = arith.constant 1 : i32
    %c0_i32 = arith.constant 0 : i32
    %29 = vector.broadcast %c1_i32 : i32 to vector<8x1xi32>
    %30 = vector.broadcast %c0_i32 : i32 to vector<8x1xi32>
    %31 = arith.select %28, %29, %30 : vector<8x1xi1>, vector<8x1xi32>
    %c0_27 = arith.constant 0 : index
    %c0_28 = arith.constant 0 : index
    %32 = vector.load %arg5[%c0_27, %c0_28] : memref<8x1xi32, #tpu.memory_space<vmem>>, vector<8x1xi32>
    tpu.vector_store %arg5[%c0_27, %c0_28], %31 {strides = array<i32>} : memref<8x1xi32, #tpu.memory_space<vmem>>, vector<8x1xi32>,
    %cst_29 = arith.constant dense<0.000000e+00> : vector<64x32xf32>
    %33 = tpu.matmul %1, %11, %cst_29 {dimension_numbers = #tpu.dot_dimension_numbers<[1], [0], [0], [1], [0, 0, 1, 1], [], []>} : vector<64x16xf32>, vector<16x32xf32>, vector<64x32xf32> -> vector<64x32xf32>
    %cst_30 = arith.constant dense<0.000000e+00> : vector<64x32xf32>
    %34 = tpu.matmul %33, %12, %cst_30 {dimension_numbers = #tpu.dot_dimension_numbers<[1], [0], [0], [1], [0, 0, 1, 1], [], []>} : vector<64x32xf32>, vector<32x32xf32>, vector<64x32xf32> -> vector<64x32xf32>
    %35 = vector.broadcast %13 : vector<1x32xf32> to vector<64x32xf32>
    %36 = arith.addf %34, %35 : vector<64x32xf32>
    %cst_31 = arith.constant dense<0.000000e+00> : vector<8x32xf32>
    %37 = tpu.matmul %5, %36, %cst_31 {dimension_numbers = #tpu.dot_dimension_numbers<[1], [0], [0], [1], [0, 0, 1, 1], [], []>} : vector<8x64xf32>, vector<64x32xf32>, vector<8x32xf32> -> vector<8x32xf32>
    %c0_32 = arith.constant 0 : index
    %c0_33 = arith.constant 0 : index
    %38 = vector.load %arg4[%c0_32, %c0_33] : memref<8x32xf32, #tpu.memory_space<vmem>>, vector<8x32xf32>
    tpu.vector_store %arg4[%c0_32, %c0_33], %37 {strides = array<i32>} : memref<8x32xf32, #tpu.memory_space<vmem>>, vector<8x32xf32>,
    return
  }
}

</mosaic_0001>

<bundles_post_ra>
// kernel: encode_segment.1
= control target key start
LH: loop header
LB: loop body
LE: loop exit
PB: predicated region body
PF: predicated region fallthrough
CT: control target
= control target key end

     0   :  { %11 = vsyncpa [#allocation3], 0  ;;  %vm50_vm0 = vcmask 130048   ;;  %s1448_s0 = inlined_call_operand.vmem [shape: f32[112,64], index: 0, kind: input, shape index: {}]   ;;  %s1449_s1 = inlined_call_operand.vmem [shape: f32[152,32], index: 1, kind: input, shape index: {}]   ;;  %s1450_s2 = inlined_call_operand.hbm [shape: f32[8,32], index: 2, kind: output, shape index: {0}]   ;;  %s1451_s3 = inlined_call_operand.hbm [shape: f32[8,32], index: 3, kind: output, shape index: {1}]   ;;  %s1452_s4 = inlined_call_operand.hbm [shape: f32[8,32], index: 4, kind: output, shape index: {2}]   ;;  %s1453_s5 = inlined_call_operand.vmem [shape: s32[8,1], index: 5, kind: output, shape index: {3}]  }
   0x1   :  { %v31_v0 = vld [vmem:[%s1449_s1] sm:$0xff]  ;;  %v32_v1 = vld [vmem:[%s1449_s1 + $0x8] sm:$0xff]  ;;  %v33_v4 = vld [vmem:[%s1449_s1 + $0x10] sm:$0xff] }
   0x2   :  { %v17_v2 = vld [vmem:[%s1448_s0] sm:$0xff]  ;;  %v1096_v3 = vpack.c.bf16 %v32_v1, %v31_v0  ;;  %v34_v5 = vld [vmem:[%s1449_s1 + $0x18] sm:$0xff]  ;;  %v36_v8 = vld [vmem:[%s1449_s1 + $0x28] sm:$0xff] }
   0x3   :  { %995 = vmatprep.mubr.msk.f32.mxu1 %vm50_vm0, %v17_v2  ;;  %v1100_v6 = vpack.c.bf16 %v34_v5, %v33_v4  ;;  %v35_v7 = vld [vmem:[%s1449_s1 + $0x20] sm:$0xff] }
   0x4   :  { %12 = vsyncpa [#allocation5], 0  ;;  %1097 = vmatprep.subr.bf16.mxu1 %v1096_v3  ;;  %v18_v9 = vld [vmem:[%s1448_s0 + $0x8] sm:$0xff]  ;;  %v1104_v10 = vpack.c.bf16 %v36_v8, %v35_v7  ;;  %vm136_vm1 = vcmask 261120   ;;  %v1226_v13 = vmov 0.0|0.0   ;;  %vm1227_vm2 = vmmov 0  }
   0x5   :  { %1099 = vmatpush3.bf16.msra.mxu1 %v1096_v3  ;;  %1108 = vmatprep.subr.bf16.mxu0 %v1226_v13  ;;  %v1228_v14 = vmov 0.0   ;;  %v910_v15 = vld [vmem:[%s1449_s1 + $0x30] ss:$0 sm:$0xff]  ;;  %v43_v17 = vld [vmem:[%s1449_s1 + $0x60] sm:$0xff]  ;;  %v44_v18 = vld [vmem:[%s1449_s1 + $0x68] sm:$0xff]  ;;  %s1229_s30 = smov 1  }
   0x6   :  { %1101 = vmatprep.subr.bf16.mxu1 %v1100_v6  ;;  %1013 = vmatprep.mubr.msk.f32.mxu0 %vm1227_vm2, %v1228_v14  ;;  %v1123_v22 = vpack.c.bf16 %v44_v18, %v43_v17  ;;  %v29_v24 = vld [vmem:[%s1448_s0 + $0x60] sm:$0xff]  ;;  %v27_v25 = vld [vmem:[%s1448_s0 + $0x50] sm:$0xff]  ;;  %v38_v26 = vld [vmem:[%s1449_s1 + $0x38] sm:$0xff]  ;;  %vm788_vm3 = vcmask 523264   ;;  %s1230_s9 = smov [#allocation4]   ;;  %s1231_s11 = smov [#allocation2]  }
   0x7   :  { %v39_v27 = vld [vmem:[%s1449_s1 + $0x40] sm:$0xff]  ;;  %v19_v28 = vld [vmem:[%s1448_s0 + $0x10] sm:$0xff]  ;;  %v20_v29 = vld [vmem:[%s1448_s0 + $0x18] sm:$0xff]  ;;  %s879_s10 = sshll.u32 %s1230_s9, 4  ;;  %s869_s12 = sshll.u32 %s1231_s11, 4  ;;  %s880_s10 = int_to_ptr.vmem [resolvable:$true] %s879_s10  ;;  %s870_s12 = int_to_ptr.vmem [resolvable:$true] %s869_s12 }
   0x8   :  { %996 = vmatmul.mubr.msk.f32.vlgmr.msra.gmra.mrb[0].mxu1 %vm50_vm0, %v18_v9  ;;  %v28_v30 = vld [vmem:[%s1448_s0 + $0x58] sm:$0xff]  ;;  %v1118_v31 = vpack.c.bf16 %v39_v27, %v38_v26  ;;  %v21_v32 = vld [vmem:[%s1448_s0 + $0x20] sm:$0xff]  ;;  %v40_v33 = vld [vmem:[%s1449_s1 + $0x48] sm:$0xff]  ;;  %s1156_s13 = scalar_lea.vmem %s880_s10, 128  ;;  %p1161_p1 = scmp.lt.s32.totalorder %s880_s10, %s880_s10 }
   0x9   :  { %1103 = vmatpush3.bf16.msra.mxu1 %v1100_v6  ;;  %v41_v34 = vld [vmem:[%s1449_s1 + $0x50] sm:$0xff]  ;;  %v22_v35 = vld [vmem:[%s1448_s0 + $0x28] sm:$0xff]  ;;  %v24_v38 = vld [vmem:[%s1448_s0 + $0x38] sm:$0xff]  ;;  %p1157_p0 = scmp.ne.s32.totalorder %s880_s10, %s1156_s13  ;;  %p1162_p2 = scmp.lt.s32.totalorder %s1156_s13, %s1156_s13 }
   0xa   :  { %1105 = vmatprep.subr.bf16.mxu1 %v1104_v10  ;;  %v1121_v36 = vpack.c.bf16 %v41_v34, %v40_v33  ;;  %v23_v37 = vld [vmem:[%s1448_s0 + $0x30] sm:$0xff]  ;;  %v25_v39 = vld [vmem:[%s1448_s0 + $0x40] sm:$0xff]  ;;  %v26_v40 = vld [vmem:[%s1448_s0 + $0x48] sm:$0xff] }
   0xb   :  { %v45_v41 = vld [vmem:[%s1449_s1 + $0x70] sm:$0xff]  ;;  %v46_v42 = vld [vmem:[%s1449_s1 + $0x78] sm:$0xff]  ;;  %v47_v44 = vld [vmem:[%s1449_s1 + $0x80] sm:$0xff]  ;;  %p1163_p3 = por %p1162_p2, %p1161_p1 }
   0xc   :  { %v1127_v43 = vpack.c.bf16 %v46_v42, %v45_v41  ;;  %v48_v45 = vld [vmem:[%s1449_s1 + $0x88] sm:$0xff]  ;;  %v916_v61 = vld [vmem:[%s1449_s1 + $0x58] ss:$0 sm:$0xff]  ;;  %v926_v1 = vld [vmem:[%s1449_s1 + $0x90] ss:$0 sm:$0xff] }
   0xd   :  { %1107 = vmatpush3.bf16.msra.mxu1 %v1104_v10  ;;  %v1131_v46 = vpack.c.bf16 %v48_v45, %v47_v44  ;;  %p1164_p4 = pnand %p1163_p3, %p1157_p0 }
   0xe   :  { %1114 = vmatprep.subr.bf16.mxu1 %v1226_v13 }
  0xdb   :  { %v997_v11 = vpop.f32.mrb[0].mxu1 }
  0xdc   :  { %v123_v12 = vpop.f32.mrb[1].mxu1 }
  0xdd   :  { %1006 = vmatprep.mubr.msk.f32.mxu1 %vm136_vm1, %v123_v12 }
  0xde   :  { %1007 = vmatmul.mubr.msk.f32.vlgmr.msra.gmra.mrb[2].mxu1 %vm136_vm1, %v997_v11 }
  0xdf   :  { %1027 = vmatprep.mubr.msk.f32.mxu1 %vm1227_vm2, %v1228_v14 }
 0x1b1   :  { %v1008_v16 = vpop.f32.mrb[2].mxu1 }
 0x1b2   :  { %v215_v19 = vadd.f32 %v1008_v16, %v910_v15  ;;  %v209_v20 = vpop.f32.mrb[3].mxu1 }
 0x1b3   :  { %v210_v21 = vadd.f32 %v910_v15, %v209_v20 }
 0x1b5   :  { %v1109_v23 = vpack.c.bf16 %v215_v19, %v210_v21 }
 0x1b7   :  { %1110 = vmatpush3.bf16.msra.mxu0 %v1109_v23  ;;  %1116 = vmatpush3.bf16.msra.mxu1 %v1109_v23 }
 0x1b8   :  { %1111 = vmatprep.subr.bf16.mxu0 %v1226_v13  ;;  %1124 = vmatprep.subr.bf16.mxu1 %v1123_v22 }
 0x1ba   :  { %1028 = vmatmul.mubr.msk.f32.vlgmr.msra.gmra.mrb[4].mxu1 %vm50_vm0, %v29_v24  ;;  %1014 = vmatmul.mubr.msk.f32.vlgmr.msra.gmra.mrb[0].mxu0 %vm50_vm0, %v27_v25 }
 0x1bb   :  { %1113 = vmatpush3.bf16.msra.mxu0 %v1109_v23  ;;  %1126 = vmatpush3.bf16.msra.mxu1 %v1123_v22  ;;  %v30_v23 = vld [vmem:[%s1448_s0 + $0x68] sm:$0xff] }
 0x1bc   :  { %1045 = vmatprep.mubr.msk.f32.mxu1 %vm50_vm0, %v19_v28  ;;  %1020 = vmatprep.mubr.msk.f32.mxu0 %vm1227_vm2, %v1228_v14 }
 0x1bd   :  { %1117 = vmatprep.subr.bf16.mxu0 %v1226_v13  ;;  %1135 = vmatprep.subr.bf16.mxu1 %v1226_v13 }
 0x1be   :  { %1046 = vmatmul.mubr.msk.f32.vlgmr.msra.gmra.mrb[6].mxu1 %vm50_vm0, %v20_v29  ;;  %1021 = vmatmul.mubr.msk.f32.vlgmr.msra.gmra.mrb[2].mxu0 %vm50_vm0, %v28_v30 }
 0x1bf   :  { %1048 = vmatprep.mubr.msk.f32.mxu1 %vm50_vm0, %v21_v32  ;;  %1119 = vmatpush3.bf16.msra.mxu0 %v1118_v31 }
 0x1c0   :  { %1120 = vmatprep.subr.bf16.mxu0 %v1226_v13  ;;  %1038 = vmatprep.mubr.msk.f32.mxu0 %vm1227_vm2, %v1228_v14 }
 0x1c2   :  { %1049 = vmatmul.mubr.msk.f32.gmra.mrb[8].mxu1 %vm50_vm0, %v22_v35 }
 0x1c3   :  { %1051 = vmatprep.mubr.msk.f32.mxu1 %vm50_vm0, %v23_v37  ;;  %1122 = vmatpush3.bf16.msra.mxu0 %v1121_v36 }
 0x1c4   :  { %1128 = vmatprep.subr.bf16.mxu0 %v1127_v43 }
 0x1c6   :  { %1052 = vmatmul.mubr.msk.f32.gmra.mrb[10].mxu1 %vm50_vm0, %v24_v38 }
 0x1c7   :  { %1054 = vmatprep.mubr.msk.f32.mxu1 %vm50_vm0, %v25_v39 }
 0x1ca   :  { %1055 = vmatmul.mubr.msk.f32.gmra.mrb[12].mxu1 %vm50_vm0, %v26_v40 }
 0x1cb   :  { %1093 = vmatprep.mubr.msk.f32.mxu1 %vm1227_vm2, %v1228_v14 }
 0x28d   :  { %v435_v47 = vpop.f32.mrb[4].mxu1  ;;  %v287_v48 = vpop.f32.mrb[0].mxu0 }
 0x28e   :  { %v1029_v49 = vpop.f32.mrb[5].mxu1  ;;  %1039 = vmatmul.mubr.msk.f32.vlgmr.msra.gmra.mrb[4].mxu0 %vm136_vm1, %v435_v47  ;;  %291 = vst.msk [vmem:[#allocation2] sm:$0xff] %vm136_vm1, %v287_v48  ;;  %v1015_v50 = vpop.f32.mrb[1].mxu0 }
 0x28f   :  { %1130 = vmatpush3.bf16.msra.mxu0 %v1127_v43 }
 0x290   :  { %1132 = vmatprep.subr.bf16.mxu0 %v1131_v46 }
 0x291   :  { %v1047_v51 = vpop.f32.mrb[6].mxu1  ;;  %v361_v52 = vpop.f32.mrb[2].mxu0 }
 0x292   :  { %v616_v53 = vpop.f32.mrb[7].mxu1  ;;  %365 = vst.msk [vmem:[#allocation4] sm:$0xff] %vm136_vm1, %v361_v52  ;;  %v1022_v54 = vpop.f32.mrb[3].mxu0 }
 0x293   :  { %1134 = vmatpush3.bf16.msra.mxu0 %v1131_v46  ;;  %1065 = vmatprep.mubr.msk.f32.mxu0 %vm136_vm1, %v616_v53 }
 0x295   :  { %v1050_v55 = vpop.f32.mrb[8].mxu1 }
 0x296   :  { %1066 = vmatmul.mubr.msk.f32.vlgmr.msra.gmra.mrb[6].mxu0 %vm136_vm1, %v1047_v51  ;;  %v626_v56 = vpop.f32.mrb[9].mxu1 }
 0x297   :  { %1068 = vmatprep.mubr.msk.f32.mxu0 %vm136_vm1, %v626_v56 }
 0x299   :  { %v1053_v57 = vpop.f32.mrb[10].mxu1 }
 0x29a   :  { %1069 = vmatmul.mubr.msk.f32.gmra.mrb[8].mxu0 %vm136_vm1, %v1050_v55  ;;  %v636_v58 = vpop.f32.mrb[11].mxu1 }
 0x29b   :  { %1071 = vmatprep.mubr.msk.f32.mxu0 %vm136_vm1, %v636_v58 }
 0x29d   :  { %v1056_v59 = vpop.f32.mrb[12].mxu1 }
 0x29e   :  { %1072 = vmatmul.mubr.msk.f32.gmra.mrb[10].mxu0 %vm136_vm1, %v1053_v57  ;;  %v646_v60 = vpop.f32.mrb[13].mxu1 }
 0x29f   :  { %1074 = vmatprep.mubr.msk.f32.mxu0 %vm136_vm1, %v646_v60 }
 0x2a2   :  { %1075 = vmatmul.mubr.msk.f32.gmra.mrb[12].mxu0 %vm136_vm1, %v1056_v59 }
 0x361   :  { %v512_v62 = vpop.f32.mrb[4].mxu0 }
 0x362   :  { %v1395_v63 = vadd.f32 %v916_v61, %v512_v62  ;;  %v1040_v0 = vpop.f32.mrb[5].mxu0 }
 0x364   :  { %517 = vrot.lane.b32.xlu0 %v1395_v63, %s1229_s30 }
 0x369   :  { %v1067_v2 = vpop.f32.mrb[6].mxu0 }
 0x36a   :  { %v755_v3 = vadd.f32 %v1067_v2, %v926_v1  ;;  %v749_v4 = vpop.f32.mrb[7].mxu0 }
 0x36b   :  { %v750_v5 = vadd.f32 %v926_v1, %v749_v4 }
 0x36d   :  { %v1136_v6 = vpack.c.bf16 %v755_v3, %v750_v5  ;;  %v1070_v7 = vpop.f32.mrb[8].mxu0 }
 0x36e   :  { %v765_v8 = vadd.f32 %v1070_v7, %v926_v1  ;;  %v759_v9 = vpop.f32.mrb[9].mxu0 }
 0x36f   :  { %v760_v10 = vadd.f32 %v926_v1, %v759_v9  ;;  %1137 = vmatpush3.bf16.msra.mxu1 %v1136_v6 }
 0x370   :  { %1138 = vmatprep.subr.bf16.mxu1 %v1226_v13 }
 0x371   :  { %v1139_v11 = vpack.c.bf16 %v765_v8, %v760_v10  ;;  %v1073_v12 = vpop.f32.mrb[10].mxu0 }
 0x372   :  { %v775_v14 = vadd.f32 %v1073_v12, %v926_v1  ;;  %v769_v15 = vpop.f32.mrb[11].mxu0 }
 0x373   :  { %v770_v16 = vadd.f32 %v926_v1, %v769_v15  ;;  %1140 = vmatpush3.bf16.msra.mxu1 %v1139_v11 }
 0x374   :  { %1141 = vmatprep.subr.bf16.mxu1 %v1226_v13 }
 0x375   :  { %v1142_v17 = vpack.c.bf16 %v775_v14, %v770_v16  ;;  %v1076_v18 = vpop.f32.mrb[12].mxu0 }
 0x376   :  { %v785_v19 = vadd.f32 %v1076_v18, %v926_v1  ;;  %v779_v20 = vpop.f32.mrb[13].mxu0 }
 0x377   :  { %v780_v21 = vadd.f32 %v926_v1, %v779_v20  ;;  %1143 = vmatpush3.bf16.msra.mxu1 %v1142_v17 }
 0x378   :  { %1144 = vmatprep.subr.bf16.mxu1 %v1226_v13 }
 0x379   :  { %v1145_v22 = vpack.c.bf16 %v785_v19, %v780_v21 }
 0x37b   :  { %1146 = vmatpush3.bf16.msra.mxu1 %v1145_v22 }
 0x37e   :  { %1094 = vmatmul.mubr.msk.f32.vlgmr.msra.gmra.mrb[14].mxu1 %vm788_vm3, %v30_v23 }
 0x37f   :  { %1167 = shalt.err (!%p1164_p4)
}
 0x380   :  { %s1168_s16 = scalar_lea.hbm %s1451_s3, 128 }
 0x381   :  { %p1169_p5 = scmp.ne.s32.totalorder %s1451_s3, %s1168_s16  ;;  %p1172_p6 = scmp.lt.u32.totalorder %s1168_s16, %s1451_s3 }
 0x383   :  { %p1174_p7 = pnand %p1172_p6, %p1169_p5 }
 0x385   :  { %1177 = shalt.err (!%p1174_p7)
}
 0x386   :  { %882 = dma.vmem_to_hbm [thread:$0]  %s880_s10, 128, %s1451_s3, [#allocation5]  }
 0x387   :  { %s1178_s22 = scalar_lea.vmem %s870_s12, 128  ;;  %p1183_p9 = scmp.lt.s32.totalorder %s870_s12, %s870_s12 }
 0x388   :  { %p1179_p8 = scmp.ne.s32.totalorder %s870_s12, %s1178_s22  ;;  %p1184_p10 = scmp.lt.s32.totalorder %s1178_s22, %s1178_s22 }
 0x38a   :  { %p1185_p11 = por %p1184_p10, %p1183_p9 }
 0x38c   :  { %p1186_p12 = pnand %p1185_p11, %p1179_p8 }
 0x38e   :  { %1189 = shalt.err (!%p1186_p12)
}
 0x38f   :  { %s1190_s25 = scalar_lea.hbm %s1450_s2, 128 }
 0x390   :  { %p1191_p13 = scmp.ne.s32.totalorder %s1450_s2, %s1190_s25  ;;  %p1194_p0 = scmp.lt.u32.totalorder %s1190_s25, %s1450_s2 }
 0x392   :  { %p1196_p1 = pnand %p1194_p0, %p1191_p13 }
 0x394   :  { %1199 = shalt.err (!%p1196_p1)
}
 0x395   :  { %872 = dma.vmem_to_hbm [thread:$0]  %s870_s12, 128, %s1450_s2, [#allocation3]   ;;  %v1232_v24 = vmov 0   ;;  %vm524_vm5 = vcmask 7168  }
 0x396   :  { %s1233_s6 = smov 127   ;;  %s1234_s8 = smov [#allocation6]  }
 0x397   :  { %s889_s9 = sshll.u32 %s1234_s8, 4  ;;  %s890_s9 = int_to_ptr.vmem [resolvable:$true] %s889_s9 }
 0x398   :  { %s1200_s2 = scalar_lea.vmem %s890_s9, 128  ;;  %p1205_p3 = scmp.lt.s32.totalorder %s890_s9, %s890_s9 }
 0x399   :  { %p1201_p2 = scmp.ne.s32.totalorder %s890_s9, %s1200_s2  ;;  %p1206_p4 = scmp.lt.s32.totalorder %s1200_s2, %s1200_s2 }
 0x39b   :  { %p1207_p5 = por %p1206_p4, %p1205_p3 }
 0x39d   :  { %p1208_p6 = pnand %p1207_p5, %p1201_p2 }
 0x3d6   :  { %v518_v13 = vpop.permute.xlu0 %517 }
 0x3d7   :  { %vm520_vm4 = vcmp.gt.f32.partialorder %v1395_v63, %v518_v13 }
 0x3d8   :  { %v521_v25 = vsel %vm520_vm4, 1, %v1232_v24 }
 0x3d9   :  { %522 = vrot.lane.b32.xlu0 %v521_v25, %s1233_s6 }
 0x44b   :  { %v523_v26 = vpop.permute.xlu0 %522 }
 0x44c   :  { %525 = vst.msk [vmem:[%s1453_s5] sm:$0xff] %vm524_vm5, %v523_v26 }
 0x451   :  { %v858_v27 = vpop.f32.mrb[14].mxu1 }
 0x452   :  { %862 = vst.msk [vmem:[#allocation6] sm:$0xff] %vm136_vm1, %v858_v27  ;;  %v1095_v28 = vpop.f32.mrb[15].mxu1 }
 0x453   :  { %1211 = shalt.err (!%p1208_p6)
}
 0x454   :  { %s1212_s12 = scalar_lea.hbm %s1452_s4, 128 }
 0x455   :  { %p1213_p7 = scmp.ne.s32.totalorder %s1452_s4, %s1212_s12  ;;  %p1216_p8 = scmp.lt.u32.totalorder %s1212_s12, %s1452_s4 }
 0x457   :  { %p1218_p9 = pnand %p1216_p8, %p1213_p7 }
 0x459   :  { %1221 = shalt.err (!%p1218_p9)
}
 0x45a   :  { %892 = dma.vmem_to_hbm [thread:$0]  %s890_s9, 128, %s1452_s4, [#allocation5]  }
 0x45b   :  { %1222 = dma.done.wait [#allocation3], 128  }
 0x45c   :  { %1223 = vsyncadd [#allocation3], 4294967168 }
 0x45d   :  { %1224 = dma.done.wait [#allocation5], 256  }
 0x45e   :  { %1225 = vsyncadd [#allocation5], 4294967040 }
 0x45f   :  { %906 = vsyncpa [#allocation3], 1 }
 0x460   :  { %907 = vsyncpa [#allocation5], 1 }

</bundles_post_ra>
